<compile_context>
chip_gen: v5e
topology: v5e:2x2
jax: 0.10.0
libtpu: 0.0.40
codegen_flags: <defaults>
</compile_context>

<pallas_src>
import jax
import jax.numpy as jnp
from jax.experimental import pallas as pl
from jax.experimental.pallas import tpu as pltpu


def _round_up(x, m):
    return -(-x // m) * m


def mlp_kernel(x_ref, w1_ref, b1_ref, w2_ref, b2_ref, o_ref):
    # x arrives as f32 straight from HBM; cast to bf16 on the VPU (hidden under
    # the DMA) so the MXU sees bf16 operands with f32 accumulation.
    x = x_ref[...].astype(jnp.bfloat16)
    h = jnp.dot(x, w1_ref[...], preferred_element_type=jnp.float32)
    # Bias add + ReLU in f32 on the VPU (native on v5e/v6e/v7x).
    h = jnp.maximum(h + b1_ref[...], 0.0)
    out = jnp.dot(h.astype(jnp.bfloat16), w2_ref[...],
                  preferred_element_type=jnp.float32)
    out = out + b2_ref[...]
    # w2/b2 are lane-padded (N -> multiple of 128) for a clean MXU shape; store
    # only the real action columns so HBM output traffic is unpadded.
    o_ref[...] = out[:, : o_ref.shape[-1]].astype(o_ref.dtype)


def prepare_params(w1, b1, w2, b2):
    """One-time weight prep, hoisted out of the per-call forward path.

    Casts matmul operands to bf16 and lane-pads the second layer (N -> multiple
    of 128) so the in-kernel second matmul is MXU friendly. Call ONCE at init.
    """
    num_actions = w2.shape[1]
    n_pad = _round_up(num_actions, 128)
    if n_pad != num_actions:
        w2 = jnp.pad(w2, ((0, 0), (0, n_pad - num_actions)))
        b2 = jnp.pad(b2, ((0, 0), (0, n_pad - num_actions)))
    return (w1.astype(jnp.bfloat16),
            b1.astype(jnp.float32),
            w2.astype(jnp.bfloat16),
            b2.astype(jnp.float32))


def mlp_forward(x, w1_bf, b1, w2_bf, b2, num_actions, *, block_rows=1024):
    """x:[B,obs] f32; prepared weights from prepare_params -> [B,num_actions] f32."""
    batch, obs_dim = x.shape
    hidden = w1_bf.shape[1]
    n_pad = w2_bf.shape[1]

    # Row tile: multiple of 16 (bf16 sublane packing of the x tile). For large
    # batches prefer >= 2 tiles so the "parallel" axis can use both v7x
    # TensorCores; v5e/v6e (1 TC) are unaffected.
    if batch > 256:
        tile = min(block_rows, _round_up(-(-batch // 2), 16))
    else:
        tile = min(block_rows, _round_up(batch, 16))
    tile = max(tile, 16)

    num_tiles = pl.cdiv(batch, tile)  # ragged trailing block handled by Pallas
    out_shape = jax.ShapeDtypeStruct((batch, num_actions), jnp.float32)

    if num_tiles == 1:
        # Single step: no grid / pipeline bookkeeping; whole working set
        # (x tile, ~80 KiB of weights, tiny output) lives in VMEM.
        return pl.pallas_call(mlp_kernel, out_shape=out_shape)(
            x, w1_bf, b1, w2_bf, b2)

    return pl.pallas_call(
        mlp_kernel,
        out_shape=out_shape,
        grid_spec=pltpu.PrefetchScalarGridSpec(
            num_scalar_prefetch=0,
            grid=(num_tiles,),
            in_specs=[
                pl.BlockSpec((tile, obs_dim), lambda i: (i, 0)),    # pipelined
                pl.BlockSpec((obs_dim, hidden), lambda i: (0, 0)),  # resident
                pl.BlockSpec((1, hidden), lambda i: (0, 0)),        # resident
                pl.BlockSpec((hidden, n_pad), lambda i: (0, 0)),    # resident
                pl.BlockSpec((1, n_pad), lambda i: (0, 0)),         # resident
            ],
            out_specs=pl.BlockSpec((tile, num_actions), lambda i: (i, 0)),
        ),
        compiler_params=pltpu.CompilerParams(
            dimension_semantics=("parallel",),  # megacore-shardable on v7x
        ),
    )(x, w1_bf, b1, w2_bf, b2)


def init_params(key, obs_dim, hidden, num_actions):
    # Mimic PyTorch nn.Linear default init: U(-1/sqrt(fan_in), 1/sqrt(fan_in)).
    k1, k2, k3, k4 = jax.random.split(key, 4)
    bound1 = 1.0 / jnp.sqrt(obs_dim)
    bound2 = 1.0 / jnp.sqrt(hidden)
    w1 = jax.random.uniform(k1, (obs_dim, hidden), jnp.float32, -bound1, bound1)
    b1 = jax.random.uniform(k2, (1, hidden), jnp.float32, -bound1, bound1)
    w2 = jax.random.uniform(k3, (hidden, num_actions), jnp.float32, -bound2, bound2)
    b2 = jax.random.uniform(k4, (1, num_actions), jnp.float32, -bound2, bound2)
    return w1, b1, w2, b2


if __name__ == "__main__":
    key = jax.random.PRNGKey(0)
    kx, kp, kx2, kx3 = jax.random.split(key, 4)

    obs_dim = 32      # obs_shape = (32,)
    hidden = 256      # fixed by the module
    num_actions = 4

    # TODO(synk): Adam optimizer state / training step not implemented (forward only).
    w1, b1, w2, b2 = init_params(kp, obs_dim, hidden, num_actions)
    # Weight prep (bf16 cast + lane pad) happens exactly once, outside the
    # per-call forward path.
    w1_bf, b1_p, w2_bf, b2_p = prepare_params(w1, b1, w2, b2)

    def ref_fn(x):
        return jnp.maximum(x @ w1 + b1, 0.0) @ w2 + b2

    # 1) Small batch -> single-step (no-grid) fast path.
    x_small = jax.random.normal(kx, (8, obs_dim), dtype=jnp.float32)
    out_small = jax.block_until_ready(
        mlp_forward(x_small, w1_bf, b1_p, w2_bf, b2_p, num_actions))
    assert out_small.shape == (8, num_actions)
    # bf16 matmul operands -> loosened tolerance vs. full-f32 reference.
    assert jnp.allclose(out_small, ref_fn(x_small), atol=5e-2, rtol=5e-2)

    # 2) batch > 256 -> >= 2 row tiles ("parallel" axis uses both v7x TCs) with
    #    a ragged trailing block (no jnp.pad of x).
    x_mid = jax.random.normal(kx2, (300, obs_dim), dtype=jnp.float32)
    out_mid = jax.block_until_ready(
        mlp_forward(x_mid, w1_bf, b1_p, w2_bf, b2_p, num_actions))
    assert out_mid.shape == (300, num_actions)
    assert jnp.allclose(out_mid, ref_fn(x_mid), atol=5e-2, rtol=5e-2)

    # 3) Multi-tile pipelined grid path with a small explicit tile + ragged tail.
    x_big = jax.random.normal(kx3, (200, obs_dim), dtype=jnp.float32)
    out_big = jax.block_until_ready(
        mlp_forward(x_big, w1_bf, b1_p, w2_bf, b2_p, num_actions,
                    block_rows=64))
    assert out_big.shape == (200, num_actions)
    assert jnp.allclose(out_big, ref_fn(x_big), atol=5e-2, rtol=5e-2)

    print("KERNEL_OK")
</pallas_src>

<mosaic_0001>
module attributes {stable_mosaic.version = 11 : i64} {
  func.func @mlp_kernel(%arg0: memref<8x32xf32, #tpu.memory_space<vmem>>, %arg1: memref<32x256xbf16, #tpu.memory_space<vmem>>, %arg2: memref<1x256xf32, #tpu.memory_space<vmem>>, %arg3: memref<256x128xbf16, #tpu.memory_space<vmem>>, %arg4: memref<1x128xf32, #tpu.memory_space<vmem>>, %arg5: memref<8x4xf32, #tpu.memory_space<vmem>>) attributes {dimension_semantics = [], scalar_prefetch = 0 : i64, scratch_operands = 0 : i64, tpu.core_type = #tpu.core_type<tc>} {
    %c0 = arith.constant 0 : index
    %c0_0 = arith.constant 0 : index
    %0 = vector.load %arg0[%c0, %c0_0] : memref<8x32xf32, #tpu.memory_space<vmem>>, vector<8x32xf32>
    %1 = arith.truncf %0 : vector<8x32xf32> to vector<8x32xbf16>
    %c0_1 = arith.constant 0 : index
    %c0_2 = arith.constant 0 : index
    %2 = vector.load %arg1[%c0_1, %c0_2] : memref<32x256xbf16, #tpu.memory_space<vmem>>, vector<32x256xbf16>
    %cst = arith.constant dense<0.000000e+00> : vector<8x256xf32>
    %3 = tpu.matmul %1, %2, %cst {dimension_numbers = #tpu.dot_dimension_numbers<[1], [0], [0], [1], [0, 0, 1, 1], [], []>} : vector<8x32xbf16>, vector<32x256xbf16>, vector<8x256xf32> -> vector<8x256xf32>
    %c0_3 = arith.constant 0 : index
    %c0_4 = arith.constant 0 : index
    %4 = vector.load %arg2[%c0_3, %c0_4] : memref<1x256xf32, #tpu.memory_space<vmem>>, vector<1x256xf32>
    %5 = vector.broadcast %4 : vector<1x256xf32> to vector<8x256xf32>
    %6 = arith.addf %3, %5 : vector<8x256xf32>
    %cst_5 = arith.constant 0.000000e+00 : f32
    %7 = vector.broadcast %cst_5 : f32 to vector<8x256xf32>
    %8 = arith.maximumf %6, %7 : vector<8x256xf32>
    %9 = arith.truncf %8 : vector<8x256xf32> to vector<8x256xbf16>
    %c0_6 = arith.constant 0 : index
    %c0_7 = arith.constant 0 : index
    %10 = vector.load %arg3[%c0_6, %c0_7] : memref<256x128xbf16, #tpu.memory_space<vmem>>, vector<256x128xbf16>
    %cst_8 = arith.constant dense<0.000000e+00> : vector<8x128xf32>
    %11 = tpu.matmul %9, %10, %cst_8 {dimension_numbers = #tpu.dot_dimension_numbers<[1], [0], [0], [1], [0, 0, 1, 1], [], []>} : vector<8x256xbf16>, vector<256x128xbf16>, vector<8x128xf32> -> vector<8x128xf32>
    %c0_9 = arith.constant 0 : index
    %c0_10 = arith.constant 0 : index
    %12 = vector.load %arg4[%c0_9, %c0_10] : memref<1x128xf32, #tpu.memory_space<vmem>>, vector<1x128xf32>
    %13 = vector.broadcast %12 : vector<1x128xf32> to vector<8x128xf32>
    %14 = arith.addf %11, %13 : vector<8x128xf32>
    %15 = vector.extract_strided_slice %14 {offsets = [0, 0], sizes = [8, 4], strides = [1, 1]} : vector<8x128xf32> to vector<8x4xf32>
    %c0_11 = arith.constant 0 : index
    %c0_12 = arith.constant 0 : index
    %16 = vector.load %arg5[%c0_11, %c0_12] : memref<8x4xf32, #tpu.memory_space<vmem>>, vector<8x4xf32>
    tpu.vector_store %arg5[%c0_11, %c0_12], %15 {strides = array<i32>} : memref<8x4xf32, #tpu.memory_space<vmem>>, vector<8x4xf32>,
    return
  }
}

</mosaic_0001>

<bundles_post_ra>
// kernel: tpu_custom_call.1
= control target key start
LH: loop header
LB: loop body
LE: loop exit
PB: predicated region body
PF: predicated region fallthrough
CT: control target
= control target key end

     0   :  { %10 = vsyncpa [#allocation3], 0  ;;  %s582_s0 = inlined_call_operand.hbm [shape: f32[8,32], index: 0, kind: input, shape index: {}]   ;;  %s583_s1 = inlined_call_operand.hbm [shape: bf16[32,256], index: 1, kind: input, shape index: {}]   ;;  %s584_s2 = inlined_call_operand.hbm [shape: f32[1,256], index: 2, kind: input, shape index: {}]   ;;  %s585_s3 = inlined_call_operand.hbm [shape: bf16[256,128], index: 3, kind: input, shape index: {}]   ;;  %s586_s4 = inlined_call_operand.vmem [shape: f32[1,128], index: 4, kind: input, shape index: {}]   ;;  %s587_s5 = inlined_call_operand.vmem [shape: f32[8,4], index: 5, kind: output, shape index: {}]  }
   0x1   :  { %11 = vsyncpa [#allocation5], 0  ;;  %s28_s20 = sshll.u32 %s583_s1, 4  ;;  %s29_s20 = int_to_ptr.hbm [resolvable:$true] %s28_s20 }
   0x2   :  { %12 = vsyncpa [#allocation8], 0  ;;  %s526_s21 = smov [#allocation4]   ;;  %s18_s25 = sshll.u32 %s582_s0, 4  ;;  %s19_s25 = int_to_ptr.hbm [resolvable:$true] %s18_s25 }
   0x3   :  { %s30_s22 = sshll.u32 %s526_s21, 4  ;;  %s527_s26 = smov 128   ;;  %s31_s22 = int_to_ptr.vmem [resolvable:$true] %s30_s22 }
   0x4   :  { %s528_s27 = smov 8   ;;  %s529_s28 = smov [#allocation2]  }
   0x5   :  { %36 = dma.hbm_to_vmem [thread:$0]  %s29_s20, 512, %s31_s22, [#allocation5], %s527_s26, %s527_s26, %s528_s27  }
   0x6   :  { %s20_s29 = sshll.u32 %s529_s28, 4  ;;  %s42_s7 = sshll.u32 %s584_s2, 4  ;;  %s21_s29 = int_to_ptr.vmem [resolvable:$true] %s20_s29  ;;  %s43_s7 = int_to_ptr.hbm [resolvable:$true] %s42_s7 }
   0x7   :  { %23 = dma.hbm_to_vmem [thread:$0]  %s19_s25, 128, %s21_s29, [#allocation3]  }
   0x8   :  { %s52_s9 = sshll.u32 %s585_s3, 4  ;;  %s530_s10 = smov [#allocation6]   ;;  %s53_s9 = int_to_ptr.hbm [resolvable:$true] %s52_s9 }
   0x9   :  { %s44_s11 = sshll.u32 %s530_s10, 4  ;;  %s531_s0 = smov [#allocation7]   ;;  %s45_s11 = int_to_ptr.vmem [resolvable:$true] %s44_s11 }
   0xa   :  { %47 = dma.hbm_to_vmem [thread:$0]  %s43_s7, 32, %s45_s11, [#allocation5]  }
   0xb   :  { %s54_s12 = sshll.u32 %s531_s0, 4  ;;  %s532_s13 = smov 64   ;;  %s55_s12 = int_to_ptr.vmem [resolvable:$true] %s54_s12 }
   0xc   :  { %s533_s14 = smov 4  }
   0xd   :  { %60 = dma.hbm_to_vmem [thread:$0]  %s53_s9, 2048, %s55_s12, [#allocation8], %s532_s13, %s532_s13, %s533_s14  }
   0xe   :  { %520 = dma.done.wait [#allocation3], 128  }
   0xf   :  { %521 = vsyncadd [#allocation3], 4294967168 }
  0x10   :  { %522 = dma.done.wait [#allocation5], 544  }
  0x11   :  { %523 = vsyncadd [#allocation5], 4294966752 }
  0x12   :  { %524 = dma.done.wait [#allocation8], 2048  }
  0x13   :  { %525 = vsyncadd [#allocation8], 4294965248  ;;  %v323_v0 = vld [vmem:[#allocation4 + $0x10] sm:$0xf]  ;;  %v398_v1 = vld [vmem:[#allocation4 + $0x14] sm:$0xf0] }
  0x14   :  { %v397_v2 = vld [vmem:[#allocation4 + $0x14] sm:$0xf]  ;;  %v324_v3 = vor.u32 %v398_v1, %v323_v0  ;;  %v325_v4 = vld [vmem:[#allocation4 + $0x18] sm:$0xf0]  ;;  %v315_v5 = vld [vmem:[#allocation4] sm:$0xf] }
  0x15   :  { %v396_v6 = vld [vmem:[#allocation4 + $0x4] sm:$0xf0]  ;;  %v328_v7 = vor.u32 %v397_v2, %v325_v4  ;;  %v395_v8 = vld [vmem:[#allocation4 + $0x4] sm:$0xf]  ;;  %v317_v9 = vld [vmem:[#allocation4 + $0x8] sm:$0xf0] }
  0x16   :  { %122 = vmatpush.bf16.msra.mxu0 %v324_v3  ;;  %v316_v10 = vor.u32 %v396_v6, %v315_v5  ;;  %v80_v11 = vld [vmem:[#allocation2] sm:$0xff]  ;;  %v320_v14 = vor.u32 %v395_v8, %v317_v9  ;;  %vm112_vm0 = vcmask 261120   ;;  %v404_v18 = vld [vmem:[#allocation7 + $0x28] sm:$0xff]  ;;  %v403_v20 = vld [vmem:[#allocation7 + $0x20] sm:$0xff]  ;;  %vm304_vm1 = vcmask 31744  }
  0x17   :  { %v406_v12 = vld [vmem:[#allocation7 + $0x38] sm:$0xff]  ;;  %135 = vmatpush.bf16.msra.mxu1 %v328_v7  ;;  %v405_v15 = vld [vmem:[#allocation7 + $0x30] sm:$0xff]  ;;  %v81_v17 = vpack.c.bf16 %v80_v11, %v80_v11  ;;  %v412_v19 = vld [vmem:[#allocation7 + $0x68] sm:$0xff] }
  0x18   :  { %v414_v13 = vld [vmem:[#allocation7 + $0x78] sm:$0xff]  ;;  %278 = vmatpush.bf16.msra.mxu2 %v406_v12  ;;  %v413_v16 = vld [vmem:[#allocation7 + $0x70] sm:$0xff]  ;;  %v411_v21 = vld [vmem:[#allocation7 + $0x60] sm:$0xff] }
  0x19   :  { %291 = vmatpush.bf16.msra.mxu3 %v414_v13  ;;  %v402_v22 = vld [vmem:[#allocation7 + $0x18] sm:$0xff]  ;;  %v401_v24 = vld [vmem:[#allocation7 + $0x10] sm:$0xff]  ;;  %v400_v26 = vld [vmem:[#allocation7 + $0x8] sm:$0xff] }
  0x1a   :  { %123 = vmatpush.bf16.msra.mxu0 %v316_v10  ;;  %v410_v23 = vld [vmem:[#allocation7 + $0x58] sm:$0xff]  ;;  %v409_v25 = vld [vmem:[#allocation7 + $0x50] sm:$0xff]  ;;  %v408_v27 = vld [vmem:[#allocation7 + $0x48] sm:$0xff] }
  0x1b   :  { %136 = vmatpush.bf16.msra.mxu1 %v320_v14  ;;  %v399_v28 = vld [vmem:[#allocation7] sm:$0xff]  ;;  %v86_v30 = vld [vmem:[#allocation6] sm:$0x3]  ;;  %v423_v43 = vld [vmem:[%s586_s4] ss:$0 sm:$0xff] }
  0x1c   :  { %279 = vmatpush.bf16.msra.mxu2 %v405_v15  ;;  %v407_v29 = vld [vmem:[#allocation7 + $0x40] sm:$0xff]  ;;  %v88_v31 = vperm.slane %v86_v30, 0  ;;  %v89_v32 = vperm.slane %v86_v30, 1 }
  0x1d   :  { %292 = vmatpush.bf16.msra.mxu3 %v413_v16  ;;  %329 = vmatmul.msk.bf16.vlgmr.msra.gmra.mxu0 %vm112_vm0, %v81_v17 }
  0x1e   :  { %330 = vmatmul.msk.bf16.vlgmr.msra.gmra.mxu1 %vm112_vm0, %v81_v17 }
  0x20   :  { %280 = vmatpush.bf16.msra.mxu2 %v404_v18 }
  0x21   :  { %293 = vmatpush.bf16.msra.mxu3 %v412_v19 }
  0x24   :  { %281 = vmatpush.bf16.msra.mxu2 %v403_v20 }
  0x25   :  { %294 = vmatpush.bf16.msra.mxu3 %v411_v21 }
  0x28   :  { %282 = vmatpush.bf16.msra.mxu2 %v402_v22 }
  0x29   :  { %295 = vmatpush.bf16.msra.mxu3 %v410_v23 }
  0x2c   :  { %283 = vmatpush.bf16.msra.mxu2 %v401_v24 }
  0x2d   :  { %296 = vmatpush.bf16.msra.mxu3 %v409_v25 }
  0x30   :  { %284 = vmatpush.bf16.msra.mxu2 %v400_v26 }
  0x31   :  { %297 = vmatpush.bf16.msra.mxu3 %v408_v27 }
  0x34   :  { %285 = vmatpush.bf16.msra.mxu2 %v399_v28 }
  0x35   :  { %298 = vmatpush.bf16.msra.mxu3 %v407_v29 }
  0x9a   :  { %v125_v33 = vpop.f32.mrf.mxu0 }
  0x9b   :  { %v126_v34 = vadd.f32 %v125_v33, %v88_v31  ;;  %v138_v35 = vpop.f32.mrf.mxu1 }
  0x9c   :  { %v139_v36 = vadd.f32 %v138_v35, %v89_v32 }
  0x9d   :  { %v142_v37 = vmax.f32 %v126_v34, 0.0 }
  0x9e   :  { %v143_v38 = vmax.f32 %v139_v36, 0.0 }
  0x9f   :  { %v144_v39 = vpack.c.bf16 %v142_v37, %v142_v37 }
  0xa0   :  { %v145_v40 = vpack.c.bf16 %v143_v38, %v143_v38 }
  0xa1   :  { %286 = vmatmul.bf16.vlgmr.msra.gmra.mxu2 %v144_v39 }
  0xa2   :  { %299 = vmatmul.bf16.vlgmr.msra.gmra.mxu3 %v145_v40  ;;  %v127_v41 = vpop.f32.mrf.mxu0 }
  0xa3   :  { %v140_v42 = vpop.f32.mrf.mxu1 }
 0x124   :  { %v287_v44 = vpop.f32.mrf.mxu2 }
 0x125   :  { %v288_v45 = vadd.f32 %v423_v43, %v287_v44  ;;  %v300_v46 = vpop.f32.mrf.mxu3 }
 0x127   :  { %v301_v47 = vadd.f32 %v300_v46, %v288_v45 }
 0x129   :  { %305 = vst.msk [vmem:[%s587_s5] sm:$0xff] %vm304_vm1, %v301_v47 }
 0x12c   :  { %v289_v48 = vpop.f32.mrf.mxu2 }
 0x12d   :  { %v302_v49 = vpop.f32.mrf.mxu3 }
 0x12e   :  { %310 = vsyncpa [#allocation3], 1 }
 0x12f   :  { %311 = vsyncpa [#allocation5], 1 }
 0x130   :  { %312 = vsyncpa [#allocation8], 1 }

</bundles_post_ra>
